<compile_context>
chip_gen: v5e
topology: v5e:2x2
jax: 0.10.0
libtpu: 0.0.40
codegen_flags: <defaults>
</compile_context>

<pallas_src>
import jax
import jax.numpy as jnp
from jax.experimental import pallas as pl
from jax.experimental.pallas import tpu as pltpu


def _classifier_kernel(x_ref, a_ref, p_ref, w_ref, b_ref, o_ref):
    # x_ref : (1, C*H, W)    one batch element (NCHW rows flattened to c*H + h)
    # a_ref : (W, Wo)        width-pooling matrix
    # p_ref : (C*Ho, C*H)    height-pooling matrix
    # w_ref : (N, C*Ho, Wo)  fc1 weight, torch (N, 900) reshaped on host
    # b_ref : (1, N)         fc1 bias
    # o_ref : (1, 1, N)      per-batch log-probabilities
    xb = x_ref[0]                                                         # (480, 120)

    # avg_pool2d(x, 8) as two MXU matmuls (pool width, then height).
    t = jnp.dot(xb, a_ref[...], preferred_element_type=jnp.float32)      # (480, 15)
    pooled = jnp.dot(p_ref[...], t, preferred_element_type=jnp.float32)  # (60, 15)

    # Linear(900, 3): logits[n] = sum_{r,wo} pooled[r, wo] * w[n, r, wo] + b[n]
    n_out = w_ref.shape[0]
    lane = jax.lax.broadcasted_iota(jnp.int32, (1, n_out), 1)             # [[0,1,2]]
    logits = b_ref[...]                                                   # (1, N)
    for n in range(n_out):                      # static unroll, n_out == 3
        prod = pooled * w_ref[n]                                          # (60, 15)
        s = jnp.sum(prod, axis=0, keepdims=True)                          # (1, 15)
        s = jnp.sum(s, axis=1, keepdims=True)                             # (1, 1)
        logits = logits + jnp.where(lane == n, s, 0.0)                    # place at lane n

    # log_softmax(dim=1), numerically stable.
    m = jnp.max(logits, axis=1, keepdims=True)
    z = logits - m
    lse = jnp.log(jnp.sum(jnp.exp(z), axis=1, keepdims=True))
    o_ref[0] = z - lse


def classifier_forward(x, fc1_w, fc1_b):
    """x: (B, C, H, W) NCHW f32.  fc1_w: (3, 900) torch layout.  fc1_b: (3,)."""
    B, C, H, W = x.shape
    Ho, Wo = H // 8, W // 8
    R = C * Ho                                   # pooled rows per batch element (c, ho)
    N = fc1_w.shape[0]

    x3 = x.reshape(B, C * H, W)                  # free view: (B, 480, 120)
    # Block-averaging matrices (tiny constants; resident in VMEM for the whole grid).
    A = jnp.repeat(jnp.eye(Wo, dtype=jnp.float32), 8, axis=0) / 8.0       # (W, Wo)
    P = (jnp.repeat(jnp.eye(R, dtype=jnp.float32), 8, axis=0) / 8.0).T    # (R, C*H)
    # W3[n, c*15+ho, wo] == fc1_w[n, c*225 + ho*15 + wo]  (matches torch .view order)
    W3 = fc1_w.reshape(N, R, Wo)
    b2 = fc1_b.reshape(1, N)

    out = pl.pallas_call(
        _classifier_kernel,
        out_shape=jax.ShapeDtypeStruct((B, 1, N), jnp.float32),
        grid=(B,),
        in_specs=[
            pl.BlockSpec((1, C * H, W), lambda b: (b, 0, 0)),
            pl.BlockSpec((W, Wo), lambda b: (0, 0)),
            pl.BlockSpec((R, C * H), lambda b: (0, 0)),
            pl.BlockSpec((N, R, Wo), lambda b: (0, 0, 0)),
            pl.BlockSpec((1, N), lambda b: (0, 0)),
        ],
        out_specs=pl.BlockSpec((1, 1, N), lambda b: (b, 0, 0)),
        compiler_params=pltpu.CompilerParams(dimension_semantics=("parallel",)),
    )(x3, A, P, W3, b2)
    return out.reshape(B, N)


if __name__ == "__main__":
    key = jax.random.PRNGKey(0)
    kx, kw, kb = jax.random.split(key, 3)

    # The module's .view(-1, 900) implies C * (H//8) * (W//8) == 900.
    B, C, H, W = 2, 4, 120, 120
    x = jax.random.normal(kx, (B, C, H, W), dtype=jnp.float32)

    # nn.Linear(900, 3) parameters in torch layout: weight (3, 900), bias (3,).
    fc1_w = jax.random.normal(kw, (3, 900), dtype=jnp.float32) * 0.03
    fc1_b = jax.random.normal(kb, (3,), dtype=jnp.float32) * 0.01

    fwd = jax.jit(classifier_forward)
    out = jax.block_until_ready(fwd(x, fc1_w, fc1_b))

    # Pure-JAX reference (torch-equivalent) for a silent correctness check.
    pooled_ref = jnp.mean(x.reshape(B, C, H // 8, 8, W // 8, 8), axis=(3, 5))
    feats_ref = pooled_ref.reshape(B, -1)
    logits_ref = jnp.einsum("bk,nk->bn", feats_ref, fc1_w,
                            precision=jax.lax.Precision.HIGHEST) + fc1_b
    ref = jax.nn.log_softmax(logits_ref, axis=1)
    assert out.shape == (B, 3)
    assert jnp.allclose(out, ref, atol=1e-5, rtol=1e-5)

    print("KERNEL_OK")
</pallas_src>

<mosaic_0001>
module attributes {stable_mosaic.version = 11 : i64} {
  func.func @_classifier_kernel(%arg0: i32, %arg1: memref<1x480x120xf32, #tpu.memory_space<vmem>>, %arg2: memref<120x15xf32, #tpu.memory_space<vmem>>, %arg3: memref<60x480xf32, #tpu.memory_space<vmem>>, %arg4: memref<3x60x15xf32, #tpu.memory_space<vmem>>, %arg5: memref<1x3xf32, #tpu.memory_space<vmem>>, %arg6: memref<1x1x3xf32, #tpu.memory_space<vmem>>) attributes {dimension_semantics = [#tpu.dimension_semantics<parallel>], iteration_bounds = array<i64: 2>, scalar_prefetch = 0 : i64, scratch_operands = 0 : i64, tpu.core_type = #tpu.core_type<tc>, window_params = [{transform_indices = @transform_0, window_bounds = array<i64: 1, 480, 120>}, {pipeline_mode = #tpu.pipeline_mode<synchronous>, transform_indices = @transform_1, window_bounds = array<i64: 120, 15>}, {pipeline_mode = #tpu.pipeline_mode<synchronous>, transform_indices = @transform_2, window_bounds = array<i64: 60, 480>}, {pipeline_mode = #tpu.pipeline_mode<synchronous>, transform_indices = @transform_3, window_bounds = array<i64: 3, 60, 15>}, {pipeline_mode = #tpu.pipeline_mode<synchronous>, transform_indices = @transform_4, window_bounds = array<i64: 1, 3>}, {transform_indices = @transform_5, window_bounds = array<i64: 1, 1, 3>}]} {
    %c0 = arith.constant 0 : index
    %c0_0 = arith.constant 0 : index
    %c0_1 = arith.constant 0 : index
    %0 = vector.load %arg1[%c0, %c0_0, %c0_1] : memref<1x480x120xf32, #tpu.memory_space<vmem>>, vector<1x480x120xf32>
    %1 = vector.shape_cast %0 : vector<1x480x120xf32> to vector<480x120xf32>
    %c0_2 = arith.constant 0 : index
    %c0_3 = arith.constant 0 : index
    %2 = vector.load %arg2[%c0_2, %c0_3] : memref<120x15xf32, #tpu.memory_space<vmem>>, vector<120x15xf32>
    %cst = arith.constant dense<0.000000e+00> : vector<480x15xf32>
    %3 = tpu.matmul %1, %2, %cst {dimension_numbers = #tpu.dot_dimension_numbers<[1], [0], [0], [1], [0, 0, 1, 1], [], []>} : vector<480x120xf32>, vector<120x15xf32>, vector<480x15xf32> -> vector<480x15xf32>
    %c0_4 = arith.constant 0 : index
    %c0_5 = arith.constant 0 : index
    %4 = vector.load %arg3[%c0_4, %c0_5] : memref<60x480xf32, #tpu.memory_space<vmem>>, vector<60x480xf32>
    %cst_6 = arith.constant dense<0.000000e+00> : vector<60x15xf32>
    %5 = tpu.matmul %4, %3, %cst_6 {dimension_numbers = #tpu.dot_dimension_numbers<[1], [0], [0], [1], [0, 0, 1, 1], [], []>} : vector<60x480xf32>, vector<480x15xf32>, vector<60x15xf32> -> vector<60x15xf32>
    %6 = tpu.iota {dimensions = array<i32: 1>} : vector<1x3xi32>
    %c0_7 = arith.constant 0 : index
    %c0_8 = arith.constant 0 : index
    %7 = vector.load %arg5[%c0_7, %c0_8] : memref<1x3xf32, #tpu.memory_space<vmem>>, vector<1x3xf32>
    %c0_9 = arith.constant 0 : index
    %c0_10 = arith.constant 0 : index
    %c0_11 = arith.constant 0 : index
    %8 = vector.load %arg4[%c0_9, %c0_10, %c0_11] : memref<3x60x15xf32, #tpu.memory_space<vmem>>, vector<1x60x15xf32>
    %9 = vector.shape_cast %8 : vector<1x60x15xf32> to vector<60x15xf32>
    %10 = arith.mulf %5, %9 : vector<60x15xf32>
    %cst_12 = arith.constant dense<0.000000e+00> : vector<15xf32>
    %11 = vector.multi_reduction <add>, %10, %cst_12 [0] : vector<60x15xf32> to vector<15xf32>
    %12 = vector.shape_cast %11 : vector<15xf32> to vector<1x15xf32>
    %cst_13 = arith.constant dense<0.000000e+00> : vector<1xf32>
    %13 = vector.multi_reduction <add>, %12, %cst_13 [1] : vector<1x15xf32> to vector<1xf32>
    %14 = vector.shape_cast %13 : vector<1xf32> to vector<1x1xf32>
    %c0_i32 = arith.constant 0 : i32
    %15 = vector.broadcast %c0_i32 : i32 to vector<1x3xi32>
    %16 = arith.cmpi eq, %6, %15 : vector<1x3xi32>
    %cst_14 = arith.constant 0.000000e+00 : f32
    %17 = vector.shape_cast %14 : vector<1x1xf32> to vector<1x1xf32>
    %18 = vector.broadcast %17 : vector<1x1xf32> to vector<1x3xf32>
    %19 = vector.broadcast %cst_14 : f32 to vector<1x3xf32>
    %20 = arith.select %16, %18, %19 : vector<1x3xi1>, vector<1x3xf32>
    %21 = arith.addf %7, %20 : vector<1x3xf32>
    %c1 = arith.constant 1 : index
    %c0_15 = arith.constant 0 : index
    %c0_16 = arith.constant 0 : index
    %22 = vector.load %arg4[%c1, %c0_15, %c0_16] : memref<3x60x15xf32, #tpu.memory_space<vmem>>, vector<1x60x15xf32>
    %23 = vector.shape_cast %22 : vector<1x60x15xf32> to vector<60x15xf32>
    %24 = arith.mulf %5, %23 : vector<60x15xf32>
    %cst_17 = arith.constant dense<0.000000e+00> : vector<15xf32>
    %25 = vector.multi_reduction <add>, %24, %cst_17 [0] : vector<60x15xf32> to vector<15xf32>
    %26 = vector.shape_cast %25 : vector<15xf32> to vector<1x15xf32>
    %cst_18 = arith.constant dense<0.000000e+00> : vector<1xf32>
    %27 = vector.multi_reduction <add>, %26, %cst_18 [1] : vector<1x15xf32> to vector<1xf32>
    %28 = vector.shape_cast %27 : vector<1xf32> to vector<1x1xf32>
    %c1_i32 = arith.constant 1 : i32
    %29 = vector.broadcast %c1_i32 : i32 to vector<1x3xi32>
    %30 = arith.cmpi eq, %6, %29 : vector<1x3xi32>
    %cst_19 = arith.constant 0.000000e+00 : f32
    %31 = vector.shape_cast %28 : vector<1x1xf32> to vector<1x1xf32>
    %32 = vector.broadcast %31 : vector<1x1xf32> to vector<1x3xf32>
    %33 = vector.broadcast %cst_19 : f32 to vector<1x3xf32>
    %34 = arith.select %30, %32, %33 : vector<1x3xi1>, vector<1x3xf32>
    %35 = arith.addf %21, %34 : vector<1x3xf32>
    %c2 = arith.constant 2 : index
    %c0_20 = arith.constant 0 : index
    %c0_21 = arith.constant 0 : index
    %36 = vector.load %arg4[%c2, %c0_20, %c0_21] : memref<3x60x15xf32, #tpu.memory_space<vmem>>, vector<1x60x15xf32>
    %37 = vector.shape_cast %36 : vector<1x60x15xf32> to vector<60x15xf32>
    %38 = arith.mulf %5, %37 : vector<60x15xf32>
    %cst_22 = arith.constant dense<0.000000e+00> : vector<15xf32>
    %39 = vector.multi_reduction <add>, %38, %cst_22 [0] : vector<60x15xf32> to vector<15xf32>
    %40 = vector.shape_cast %39 : vector<15xf32> to vector<1x15xf32>
    %cst_23 = arith.constant dense<0.000000e+00> : vector<1xf32>
    %41 = vector.multi_reduction <add>, %40, %cst_23 [1] : vector<1x15xf32> to vector<1xf32>
    %42 = vector.shape_cast %41 : vector<1xf32> to vector<1x1xf32>
    %c2_i32 = arith.constant 2 : i32
    %43 = vector.broadcast %c2_i32 : i32 to vector<1x3xi32>
    %44 = arith.cmpi eq, %6, %43 : vector<1x3xi32>
    %cst_24 = arith.constant 0.000000e+00 : f32
    %45 = vector.shape_cast %42 : vector<1x1xf32> to vector<1x1xf32>
    %46 = vector.broadcast %45 : vector<1x1xf32> to vector<1x3xf32>
    %47 = vector.broadcast %cst_24 : f32 to vector<1x3xf32>
    %48 = arith.select %44, %46, %47 : vector<1x3xi1>, vector<1x3xf32>
    %49 = arith.addf %35, %48 : vector<1x3xf32>
    %cst_25 = arith.constant dense<0xFF800000> : vector<1xf32>
    %50 = vector.multi_reduction <maximumf>, %49, %cst_25 [1] : vector<1x3xf32> to vector<1xf32>
    %51 = vector.shape_cast %50 : vector<1xf32> to vector<1x1xf32>
    %52 = vector.broadcast %51 : vector<1x1xf32> to vector<1x3xf32>
    %53 = arith.subf %49, %52 : vector<1x3xf32>
    %54 = math.exp %53 : vector<1x3xf32>
    %cst_26 = arith.constant dense<0.000000e+00> : vector<1xf32>
    %55 = vector.multi_reduction <add>, %54, %cst_26 [1] : vector<1x3xf32> to vector<1xf32>
    %56 = vector.shape_cast %55 : vector<1xf32> to vector<1x1xf32>
    %57 = math.log %56 : vector<1x1xf32>
    %58 = vector.broadcast %57 : vector<1x1xf32> to vector<1x3xf32>
    %59 = arith.subf %53, %58 : vector<1x3xf32>
    %c0_27 = arith.constant 0 : index
    %c0_28 = arith.constant 0 : index
    %c0_29 = arith.constant 0 : index
    %60 = vector.load %arg6[%c0_27, %c0_28, %c0_29] : memref<1x1x3xf32, #tpu.memory_space<vmem>>, vector<1x1x3xf32>
    %61 = vector.shape_cast %60 : vector<1x1x3xf32> to vector<1x3xf32>
    %62 = vector.shape_cast %59 : vector<1x3xf32> to vector<1x1x3xf32>
    tpu.vector_store %arg6[%c0_27, %c0_28, %c0_29], %62 {strides = array<i32>} : memref<1x1x3xf32, #tpu.memory_space<vmem>>, vector<1x1x3xf32>,
    return
  }
  func.func @transform_0(%arg0: i32) -> (i32, i32, i32) {
    %c0_i32 = arith.constant 0 : i32
    %c0_i32_0 = arith.constant 0 : i32
    %c0_i32_1 = arith.constant 0 : i32
    return %arg0, %c0_i32, %c0_i32_0 : i32, i32, i32
  }
  func.func @transform_1(%arg0: i32) -> (i32, i32) {
    %c0_i32 = arith.constant 0 : i32
    %c0_i32_0 = arith.constant 0 : i32
    %c0_i32_1 = arith.constant 0 : i32
    return %c0_i32, %c0_i32_0 : i32, i32
  }
  func.func @transform_2(%arg0: i32) -> (i32, i32) {
    %c0_i32 = arith.constant 0 : i32
    %c0_i32_0 = arith.constant 0 : i32
    %c0_i32_1 = arith.constant 0 : i32
    return %c0_i32, %c0_i32_0 : i32, i32
  }
  func.func @transform_3(%arg0: i32) -> (i32, i32, i32) {
    %c0_i32 = arith.constant 0 : i32
    %c0_i32_0 = arith.constant 0 : i32
    %c0_i32_1 = arith.constant 0 : i32
    %c0_i32_2 = arith.constant 0 : i32
    return %c0_i32, %c0_i32_0, %c0_i32_1 : i32, i32, i32
  }
  func.func @transform_4(%arg0: i32) -> (i32, i32) {
    %c0_i32 = arith.constant 0 : i32
    %c0_i32_0 = arith.constant 0 : i32
    %c0_i32_1 = arith.constant 0 : i32
    return %c0_i32, %c0_i32_0 : i32, i32
  }
  func.func @transform_5(%arg0: i32) -> (i32, i32, i32) {
    %c0_i32 = arith.constant 0 : i32
    %c0_i32_0 = arith.constant 0 : i32
    %c0_i32_1 = arith.constant 0 : i32
    return %arg0, %c0_i32, %c0_i32_0 : i32, i32, i32
  }
}

</mosaic_0001>

<bundles_post_ra>
// kernel: classifier_forward.1
= control target key start
LH: loop header
LB: loop body
LE: loop exit
PB: predicated region body
PF: predicated region fallthrough
CT: control target
= control target key end

     0   :  { %10 = vsyncpa [#allocation3], 0  ;;  %s1903_s0 = inlined_call_operand.vmem [shape: f32[2,480,120], index: 0, kind: input, shape index: {}]   ;;  %s1904_s1 = inlined_call_operand.vmem [shape: f32[120,15], index: 1, kind: input, shape index: {}]   ;;  %s1905_s2 = inlined_call_operand.vmem [shape: f32[60,480], index: 2, kind: input, shape index: {}]   ;;  %s1906_s3 = inlined_call_operand.vmem [shape: f32[3,60,15], index: 3, kind: input, shape index: {}]   ;;  %s1907_s4 = inlined_call_operand.vmem [shape: f32[1,3], index: 4, kind: input, shape index: {}]   ;;  %s1908_s5 = inlined_call_operand.hbm [shape: f32[2,1,3], index: 5, kind: output, shape index: {}]  }
   0x1   :  { %12 = vsyncpa [#allocation3 + $0x1], 0  ;;  %s1388_s18 = smov 0   ;;  %s1390_s19 = smov 0  }
   0x2   :  { %s1392_s20 = smov 0   ;;  %s1394_s21 = smov 0  }
   0x3 LB: > { %s1409_s22 = sadd.s32 4294967295, %s1356_s21   ;;  %s1114_s23 = sadd.s32 4294967294, %s1356_s21   ;;  %s1356_s21 = sphi %s1394_s21, %s1914_s21   ;;  %s1352_s20 = sphi %s1392_s20, %s1913_s20   ;;  %s1348_s19 = sphi %s1390_s19, %s1912_s19   ;;  %s1344_s18 = sphi %s1388_s18, %s1911_s18  }
   0x4   : > { %s1413_s24 = sadd.s32 1, %s1356_s21   ;;  %s135_s25 = sadd.s32 1, %s1352_s20 }
   0x5   : > { %s132_s26 = ssub.s32 %s1356_s21, %s1413_s24  ;;  %p145_p0 = scmp.ne.s32.totalorder %s1352_s20, %s1348_s19 }
   0x6   : > { %p133_p1 = scmp.eq.s32.totalorder %s132_s26, 0  ;;  %p146_p2 = scmp.eq.s32.totalorder %s1409_s22, 1 }
   0x7   : > { %p151_p3 = scmp.ne.s32.totalorder %s1348_s19, %s1344_s18  ;;  %p152_p4 = scmp.eq.s32.totalorder %s1114_s23, 1 }
   0x8   : > { %s1424_s27 = scalar_select %p133_p1, %s1352_s20, %s135_s25  }
   0x9   : > { %p1426_p5 = por %p146_p2, %p145_p0  ;;  %p1430_p6 = por %p152_p4, %p151_p3 }
   0xa   : > { %p1117_p7 = scmp.ge.s32.totalorder %s1356_s21, 1  ;;  %p190_p8 = scmp.lt.s32.totalorder %s1356_s21, 3 }
   0xc   : > { %p191_p9 = pnand %p1117_p7, %p190_p8 }
   0xd   : > { %p217_p10 = scmp.lt.s32.totalorder (!%p191_p9), %s1409_s22, 1  ;;  %s215_s10 = sand.u32 (!%p191_p9), 1, %s1348_s19  }
   0xe   : > { %194 = sbr.rel (%p191_p9) target bundleno = 980 (0x3d4), region = 40  ;;  %s1055_s13 = scalar_lea.hbm (!%p191_p9), %s1908_s5, %s1409_s22 }
   0xf   : > { %s1059_s16 = sshll.u32 (!%p191_p9), %s1055_s13, 4  ;;  %s1047_s17 = scalar_lea.sflag (!%p191_p9), [#allocation3], %s215_s10  ;;  %s1060_s16 = int_to_ptr.hbm [resolvable:$true] %s1059_s16 }
  0x10   : > { %s1308_s23 = sshra.s32 (!%p191_p9), %s1060_s16, 4  ;;  %s1309_s23 = int_to_ptr.hbm [resolvable:$true] %s1308_s23 }
  0x11   : > { %s1310_s25 = scalar_lea.hbm (!%p191_p9), %s1309_s23, 1  ;;  %p1315_p0 = scmp.lt.s32.totalorder (!%p191_p9), %s1309_s23, %s1908_s5 }
  0x12   : > { %p1311_p11 = scmp.ne.s32.totalorder (!%p191_p9), %s1309_s23, %s1310_s25 }
  0x13   : > { %v296_v0 = vld [vmem:[%s1904_s1 + $0x70] sm:$0xff]  ;;  %v295_v1 = vld [vmem:[%s1904_s1 + $0x68] sm:$0xff]  ;;  %v294_v2 = vld [vmem:[%s1904_s1 + $0x60] sm:$0xff]  ;;  %s218_s9 = scalar_select %p217_p10, %s1409_s22, 1  ;;  %vm297_vm0 = vcmask 982016   ;;  %vm707_vm1 = vcmask 785408  }
  0x14   : > { %479 = vmatpush.msra.mxu0 %v296_v0  ;;  %1206 = vmatpush.msra.mxu2 %v296_v0  ;;  %v293_v3 = vld [vmem:[%s1904_s1 + $0x58] sm:$0xff]  ;;  %v292_v4 = vld [vmem:[%s1904_s1 + $0x50] sm:$0xff]  ;;  %v291_v5 = vld [vmem:[%s1904_s1 + $0x48] sm:$0xff]  ;;  %vm915_vm2 = vcmask 121856   ;;  %vm929_vm3 = vcmask 117760   ;;  %vm1032_vm7 = vcmask 16384   ;;  %p1312_p12 = pnand %p1311_p11, %p1426_p5 }
  0x15   : > { %1207 = vmatpush.msra.mxu3 %v296_v0  ;;  %1205 = vmatpush.msra.mxu1 %v296_v0  ;;  %v290_v6 = vld [vmem:[%s1904_s1 + $0x40] sm:$0xff]  ;;  %v289_v7 = vld [vmem:[%s1904_s1 + $0x38] sm:$0xff]  ;;  %v288_v8 = vld [vmem:[%s1904_s1 + $0x30] sm:$0xff]  ;;  %s1250_s14 = smul.u32 480, %s218_s9 }
  0x16   : > { %480 = vmatpush.msra.mxu0 %v295_v1  ;;  %1209 = vmatpush.msra.mxu2 %v295_v1  ;;  %v287_v9 = vld [vmem:[%s1904_s1 + $0x28] sm:$0xff]  ;;  %v286_v10 = vld [vmem:[%s1904_s1 + $0x20] sm:$0xff]  ;;  %v285_v11 = vld [vmem:[%s1904_s1 + $0x18] sm:$0xff]  ;;  %p1313_p13 = pneg %p1312_p12 }
  0x17   : > { %1210 = vmatpush.msra.mxu3 %v295_v1  ;;  %1208 = vmatpush.msra.mxu1 %v295_v1  ;;  %v284_v12 = vld [vmem:[%s1904_s1 + $0x10] sm:$0xff]  ;;  %v283_v13 = vld [vmem:[%s1904_s1 + $0x8] sm:$0xff]  ;;  %s1483_s30 = scalar_lea.vmem %s1903_s0, %s1250_s14  ;;  %v282_v14 = vld [vmem:[%s1904_s1] sm:$0xff]  ;;  %s216_s14 = scalar_lea.vmem [#allocation2], %s215_s10 }
  0x18   : > { %481 = vmatpush.msra.mxu0 %v294_v2  ;;  %1212 = vmatpush.msra.mxu2 %v294_v2  ;;  %v222_v15 = vld [vmem:[%s1483_s30] sm:$0xff]  ;;  %v252_v16 = vld [vmem:[%s1483_s30 + $0xf0] sm:$0xff]  ;;  %v267_v17 = vld [vmem:[%s1483_s30 + $0x168] sm:$0xff]  ;;  %s1057_s15 = sshll.u32 %s216_s14, 4  ;;  %s1058_s15 = int_to_ptr.vmem [resolvable:$true] %s1057_s15 }
  0x19   : > { %1213 = vmatpush.msra.mxu3 %v294_v2  ;;  %1211 = vmatpush.msra.mxu1 %v294_v2  ;;  %v223_v18 = vld [vmem:[%s1483_s30 + $0x8] sm:$0xff]  ;;  %v253_v19 = vld [vmem:[%s1483_s30 + $0xf8] sm:$0xff]  ;;  %v268_v20 = vld [vmem:[%s1483_s30 + $0x170] sm:$0xff] }
  0x1a   : > { %482 = vmatpush.msra.mxu0 %v293_v3  ;;  %1215 = vmatpush.msra.mxu2 %v293_v3  ;;  %v224_v21 = vld [vmem:[%s1483_s30 + $0x10] sm:$0xff]  ;;  %v254_v22 = vld [vmem:[%s1483_s30 + $0x100] sm:$0xff]  ;;  %v269_v24 = vld [vmem:[%s1483_s30 + $0x178] sm:$0xff] }
  0x1b   : > { %1216 = vmatpush.msra.mxu3 %v293_v3  ;;  %1214 = vmatpush.msra.mxu1 %v293_v3  ;;  %v246_v23 = vld [vmem:[%s1483_s30 + $0xc0] sm:$0xff]  ;;  %v225_v25 = vld [vmem:[%s1483_s30 + $0x18] sm:$0xff]  ;;  %v255_v26 = vld [vmem:[%s1483_s30 + $0x108] sm:$0xff] }
  0x1c   : > { %483 = vmatpush.msra.mxu0 %v292_v4  ;;  %1218 = vmatpush.msra.mxu2 %v292_v4  ;;  %v247_v27 = vld [vmem:[%s1483_s30 + $0xc8] sm:$0xff]  ;;  %v270_v28 = vld [vmem:[%s1483_s30 + $0x180] sm:$0xff]  ;;  %v256_v30 = vld [vmem:[%s1483_s30 + $0x110] sm:$0xff] }
  0x1d   : > { %1219 = vmatpush.msra.mxu3 %v292_v4  ;;  %1217 = vmatpush.msra.mxu1 %v292_v4  ;;  %v226_v29 = vld [vmem:[%s1483_s30 + $0x20] sm:$0xff]  ;;  %v248_v31 = vld [vmem:[%s1483_s30 + $0xd0] sm:$0xff]  ;;  %v271_v32 = vld [vmem:[%s1483_s30 + $0x188] sm:$0xff] }
  0x1e   : > { %484 = vmatpush.msra.mxu0 %v291_v5  ;;  %1221 = vmatpush.msra.mxu2 %v291_v5  ;;  %v227_v33 = vld [vmem:[%s1483_s30 + $0x28] sm:$0xff]  ;;  %v257_v34 = vld [vmem:[%s1483_s30 + $0x118] sm:$0xff]  ;;  %v272_v36 = vld [vmem:[%s1483_s30 + $0x190] sm:$0xff] }
  0x1f   : > { %1222 = vmatpush.msra.mxu3 %v291_v5  ;;  %1220 = vmatpush.msra.mxu1 %v291_v5  ;;  %v249_v35 = vld [vmem:[%s1483_s30 + $0xd8] sm:$0xff]  ;;  %v228_v37 = vld [vmem:[%s1483_s30 + $0x30] sm:$0xff]  ;;  %v258_v38 = vld [vmem:[%s1483_s30 + $0x120] sm:$0xff] }
  0x20   : > { %485 = vmatpush.msra.mxu0 %v290_v6  ;;  %1224 = vmatpush.msra.mxu2 %v290_v6  ;;  %v250_v39 = vld [vmem:[%s1483_s30 + $0xe0] sm:$0xff]  ;;  %v273_v40 = vld [vmem:[%s1483_s30 + $0x198] sm:$0xff]  ;;  %v259_v42 = vld [vmem:[%s1483_s30 + $0x128] sm:$0xff] }
  0x21   : > { %1225 = vmatpush.msra.mxu3 %v290_v6  ;;  %1223 = vmatpush.msra.mxu1 %v290_v6  ;;  %v229_v41 = vld [vmem:[%s1483_s30 + $0x38] sm:$0xff]  ;;  %v251_v43 = vld [vmem:[%s1483_s30 + $0xe8] sm:$0xff]  ;;  %v274_v44 = vld [vmem:[%s1483_s30 + $0x1a0] sm:$0xff] }
  0x22   : > { %486 = vmatpush.msra.mxu0 %v289_v7  ;;  %1227 = vmatpush.msra.mxu2 %v289_v7  ;;  %v230_v45 = vld [vmem:[%s1483_s30 + $0x40] sm:$0xff]  ;;  %v260_v46 = vld [vmem:[%s1483_s30 + $0x130] sm:$0xff]  ;;  %v275_v47 = vld [vmem:[%s1483_s30 + $0x1a8] sm:$0xff] }
  0x23   : > { %1228 = vmatpush.msra.mxu3 %v289_v7  ;;  %1226 = vmatpush.msra.mxu1 %v289_v7  ;;  %v231_v48 = vld [vmem:[%s1483_s30 + $0x48] sm:$0xff]  ;;  %v261_v49 = vld [vmem:[%s1483_s30 + $0x138] sm:$0xff]  ;;  %v276_v50 = vld [vmem:[%s1483_s30 + $0x1b0] sm:$0xff] }
  0x24   : > { %487 = vmatpush.msra.mxu0 %v288_v8  ;;  %1230 = vmatpush.msra.mxu2 %v288_v8  ;;  %v232_v51 = vld [vmem:[%s1483_s30 + $0x50] sm:$0xff]  ;;  %v262_v52 = vld [vmem:[%s1483_s30 + $0x140] sm:$0xff]  ;;  %v277_v53 = vld [vmem:[%s1483_s30 + $0x1b8] sm:$0xff] }
  0x25   : > { %1231 = vmatpush.msra.mxu3 %v288_v8  ;;  %1229 = vmatpush.msra.mxu1 %v288_v8  ;;  %v233_v54 = vld [vmem:[%s1483_s30 + $0x58] sm:$0xff]  ;;  %v263_v55 = vld [vmem:[%s1483_s30 + $0x148] sm:$0xff]  ;;  %v278_v56 = vld [vmem:[%s1483_s30 + $0x1c0] sm:$0xff] }
  0x26   : > { %488 = vmatpush.msra.mxu0 %v287_v9  ;;  %1233 = vmatpush.msra.mxu2 %v287_v9  ;;  %v234_v57 = vld [vmem:[%s1483_s30 + $0x60] sm:$0xff]  ;;  %v264_v58 = vld [vmem:[%s1483_s30 + $0x150] sm:$0xff]  ;;  %v279_v59 = vld [vmem:[%s1483_s30 + $0x1c8] sm:$0xff] }
  0x27   : > { %1234 = vmatpush.msra.mxu3 %v287_v9  ;;  %1232 = vmatpush.msra.mxu1 %v287_v9  ;;  %v235_v60 = vld [vmem:[%s1483_s30 + $0x68] sm:$0xff]  ;;  %v265_v61 = vld [vmem:[%s1483_s30 + $0x158] sm:$0xff]  ;;  %v280_v62 = vld [vmem:[%s1483_s30 + $0x1d0] sm:$0xff] }
  0x28   : > { %489 = vmatpush.msra.mxu0 %v286_v10  ;;  %1236 = vmatpush.msra.mxu2 %v286_v10  ;;  %v236_v63 = vld [vmem:[%s1483_s30 + $0x70] sm:$0xff]  ;;  %v266_v0 = vld [vmem:[%s1483_s30 + $0x160] sm:$0xff]  ;;  %v281_v1 = vld [vmem:[%s1483_s30 + $0x1d8] sm:$0xff] }
  0x29   : > { %1237 = vmatpush.msra.mxu3 %v286_v10  ;;  %1235 = vmatpush.msra.mxu1 %v286_v10  ;;  %v237_v2 = vld [vmem:[%s1483_s30 + $0x78] sm:$0xff]  ;;  %v238_v4 = vld [vmem:[%s1483_s30 + $0x80] sm:$0xff]  ;;  %v239_v7 = vld [vmem:[%s1483_s30 + $0x88] sm:$0xff] }
  0x2a   : > { %490 = vmatpush.msra.mxu0 %v285_v11  ;;  %1239 = vmatpush.msra.mxu2 %v285_v11 }
  0x2b   : > { %1240 = vmatpush.msra.mxu3 %v285_v11  ;;  %1238 = vmatpush.msra.mxu1 %v285_v11  ;;  %v240_v11 = vld [vmem:[%s1483_s30 + $0x90] sm:$0xff] }
  0x2c   : > { %491 = vmatpush.msra.mxu0 %v284_v12  ;;  %1242 = vmatpush.msra.mxu2 %v284_v12 }
  0x2d   : > { %1243 = vmatpush.msra.mxu3 %v284_v12  ;;  %1241 = vmatpush.msra.mxu1 %v284_v12 }
  0x2e   : > { %492 = vmatpush.msra.mxu0 %v283_v13  ;;  %1245 = vmatpush.msra.mxu2 %v283_v13 }
  0x2f   : > { %1246 = vmatpush.msra.mxu3 %v283_v13  ;;  %1244 = vmatpush.msra.mxu1 %v283_v13 }
  0x30   : > { %493 = vmatpush.msra.mxu0 %v282_v14  ;;  %1248 = vmatpush.msra.mxu2 %v282_v14 }
  0x31   : > { %1119 = vmatmul.msk.f32.vlgmr.msra.gmra.mxu0 %vm297_vm0, %v222_v15  ;;  %1149 = vmatmul.msk.f32.vlgmr.msra.gmra.mxu2 %vm297_vm0, %v252_v16  ;;  %v241_v16 = vld [vmem:[%s1483_s30 + $0x98] sm:$0xff] }
  0x32   : > { %1249 = vmatpush.msra.mxu3 %v282_v14  ;;  %1247 = vmatpush.msra.mxu1 %v282_v14 }
  0x33   : > { %1164 = vmatmul.msk.f32.vlgmr.msra.gmra.mxu3 %vm297_vm0, %v267_v17  ;;  %1143 = vmatmul.msk.f32.vlgmr.msra.gmra.mxu1 %vm297_vm0, %v246_v23 }
  0x39   : > { %1120 = vmatmul.msk.f32.gmra.mxu0 %vm297_vm0, %v223_v18  ;;  %1150 = vmatmul.msk.f32.gmra.mxu2 %vm297_vm0, %v253_v19 }
  0x3b   : > { %1165 = vmatmul.msk.f32.gmra.mxu3 %vm297_vm0, %v268_v20  ;;  %1144 = vmatmul.msk.f32.gmra.mxu1 %vm297_vm0, %v247_v27 }
  0x41   : > { %1121 = vmatmul.msk.f32.gmra.mxu0 %vm297_vm0, %v224_v21  ;;  %1151 = vmatmul.msk.f32.gmra.mxu2 %vm297_vm0, %v254_v22  ;;  %v242_v21 = vld [vmem:[%s1483_s30 + $0xa0] sm:$0xff] }
  0x43   : > { %1166 = vmatmul.msk.f32.gmra.mxu3 %vm297_vm0, %v269_v24  ;;  %1145 = vmatmul.msk.f32.gmra.mxu1 %vm297_vm0, %v248_v31 }
  0x49   : > { %1122 = vmatmul.msk.f32.gmra.mxu0 %vm297_vm0, %v225_v25  ;;  %1152 = vmatmul.msk.f32.gmra.mxu2 %vm297_vm0, %v255_v26  ;;  %v243_v25 = vld [vmem:[%s1483_s30 + $0xa8] sm:$0xff] }
  0x4b   : > { %1167 = vmatmul.msk.f32.gmra.mxu3 %vm297_vm0, %v270_v28  ;;  %1146 = vmatmul.msk.f32.gmra.mxu1 %vm297_vm0, %v249_v35  ;;  %v245_v35 = vld [vmem:[%s1483_s30 + $0xb8] sm:$0xff] }
  0x51   : > { %1123 = vmatmul.msk.f32.gmra.mxu0 %vm297_vm0, %v226_v29  ;;  %1153 = vmatmul.msk.f32.gmra.mxu2 %vm297_vm0, %v256_v30  ;;  %v244_v30 = vld [vmem:[%s1483_s30 + $0xb0] sm:$0xff]  ;;  %s1314_s30 = scalar_lea.hbm %s1908_s5, 2 }
  0x52   : > { %p1316_p1 = scmp.lt.s32.totalorder %s1314_s30, %s1310_s25 }
  0x53   : > { %1168 = vmatmul.msk.f32.gmra.mxu3 %vm297_vm0, %v271_v32  ;;  %1147 = vmatmul.msk.f32.gmra.mxu1 %vm297_vm0, %v250_v39 }
  0x54   : > { %p1317_p2 = por %p1316_p1, %p1315_p0 }
  0x56   : > { %p1318_p3 = pnand %p1317_p2, %p1313_p13 }
  0x59   : > { %1124 = vmatmul.msk.f32.gmra.mxu0 %vm297_vm0, %v227_v33  ;;  %1154 = vmatmul.msk.f32.gmra.mxu2 %vm297_vm0, %v257_v34 }
  0x5b   : > { %1169 = vmatmul.msk.f32.gmra.mxu3 %vm297_vm0, %v272_v36  ;;  %1148 = vmatmul.msk.f32.gmra.mxu1 %vm297_vm0, %v251_v43 }
  0x61   : > { %1125 = vmatmul.msk.f32.gmra.mxu0 %vm297_vm0, %v228_v37  ;;  %1155 = vmatmul.msk.f32.gmra.mxu2 %vm297_vm0, %v258_v38 }
  0x63   : > { %1170 = vmatmul.msk.f32.gmra.mxu3 %vm297_vm0, %v273_v40 }
  0x69   : > { %1126 = vmatmul.msk.f32.gmra.mxu0 %vm297_vm0, %v229_v41  ;;  %1156 = vmatmul.msk.f32.gmra.mxu2 %vm297_vm0, %v259_v42 }
  0x6b   : > { %1171 = vmatmul.msk.f32.gmra.mxu3 %vm297_vm0, %v274_v44 }
  0x71   : > { %1127 = vmatmul.msk.f32.gmra.mxu0 %vm297_vm0, %v230_v45  ;;  %1157 = vmatmul.msk.f32.gmra.mxu2 %vm297_vm0, %v260_v46 }
  0x73   : > { %1172 = vmatmul.msk.f32.gmra.mxu3 %vm297_vm0, %v275_v47 }
  0x79   : > { %1128 = vmatmul.msk.f32.gmra.mxu0 %vm297_vm0, %v231_v48  ;;  %1158 = vmatmul.msk.f32.gmra.mxu2 %vm297_vm0, %v261_v49 }
  0x7b   : > { %1173 = vmatmul.msk.f32.gmra.mxu3 %vm297_vm0, %v276_v50 }
  0x81   : > { %1129 = vmatmul.msk.f32.gmra.mxu0 %vm297_vm0, %v232_v51  ;;  %1159 = vmatmul.msk.f32.gmra.mxu2 %vm297_vm0, %v262_v52 }
  0x83   : > { %1174 = vmatmul.msk.f32.gmra.mxu3 %vm297_vm0, %v277_v53 }
  0x89   : > { %1130 = vmatmul.msk.f32.gmra.mxu0 %vm297_vm0, %v233_v54  ;;  %1160 = vmatmul.msk.f32.gmra.mxu2 %vm297_vm0, %v263_v55 }
  0x8b   : > { %1175 = vmatmul.msk.f32.gmra.mxu3 %vm297_vm0, %v278_v56 }
  0x91   : > { %1131 = vmatmul.msk.f32.gmra.mxu0 %vm297_vm0, %v234_v57  ;;  %1161 = vmatmul.msk.f32.gmra.mxu2 %vm297_vm0, %v264_v58 }
  0x93   : > { %1176 = vmatmul.msk.f32.gmra.mxu3 %vm297_vm0, %v279_v59 }
  0x99   : > { %1132 = vmatmul.msk.f32.gmra.mxu0 %vm297_vm0, %v235_v60  ;;  %1162 = vmatmul.msk.f32.gmra.mxu2 %vm297_vm0, %v265_v61 }
  0x9b   : > { %1177 = vmatmul.msk.f32.gmra.mxu3 %vm297_vm0, %v280_v62 }
  0xa1   : > { %1133 = vmatmul.msk.f32.gmra.mxu0 %vm297_vm0, %v236_v63  ;;  %1163 = vmatmul.msk.f32.gmra.mxu2 %vm297_vm0, %v266_v0 }
  0xa3   : > { %1178 = vmatmul.msk.f32.gmra.mxu3 %vm297_vm0, %v281_v1  ;;  %v675_v1 = vld [vmem:[%s1905_s2] sm:$0xff] }
  0xa9   : > { %1134 = vmatmul.msk.f32.gmra.mxu0 %vm297_vm0, %v237_v2 }
  0xae   : > { %v1592_v3 = vpop.f32.mrf.mxu0 }
  0xb0   : > { %v567_v13 = vpop.f32.mrf.mxu1 }
  0xb1   : > { %1135 = vmatmul.msk.f32.gmra.mxu0 %vm297_vm0, %v238_v4 }
  0xb4   : > { %v585_v5 = vpop.f32.mrf.mxu2 }
  0xb6   : > { %v1596_v6 = vpop.f32.mrf.mxu0  ;;  %v630_v8 = vpop.f32.mrf.mxu3 }
  0xb8   : > { %v570_v18 = vpop.f32.mrf.mxu1 }
  0xb9   : > { %1136 = vmatmul.msk.f32.gmra.mxu0 %vm297_vm0, %v239_v7 }
  0xbc   : > { %v588_v9 = vpop.f32.mrf.mxu2 }
  0xbd   : > { %773 = vmatpush.msrb.mxu2 %v588_v9  ;;  %v687_v9 = vld [vmem:[%s1905_s2 + $0x60] sm:$0xff] }
  0xbe   : > { %v1600_v10 = vpop.f32.mrf.mxu0  ;;  %v633_v12 = vpop.f32.mrf.mxu3 }
  0xbf   : > { %774 = vmatpush.msrb.mxu2 %v585_v5  ;;  %v679_v5 = vld [vmem:[%s1905_s2 + $0x20] sm:$0xff] }
  0xc0   : > { %v573_v22 = vpop.f32.mrf.mxu1 }
  0xc1   : > { %1137 = vmatmul.msk.f32.gmra.mxu0 %vm297_vm0, %v240_v11  ;;  %v681_v11 = vld [vmem:[%s1905_s2 + $0x30] sm:$0xff] }
  0xc4   : > { %v1604_v14 = vpop.f32.mrf.mxu2 }
  0xc6   : > { %v1606_v15 = vpop.f32.mrf.mxu0  ;;  %v636_v17 = vpop.f32.mrf.mxu3 }
  0xc7   : > { %814 = vmatpush.msrb.mxu3 %v636_v17  ;;  %v699_v17 = vld [vmem:[%s1905_s2 + $0xc0] sm:$0xff] }
  0xc8   : > { %v576_v27 = vpop.f32.mrf.mxu1 }
  0xc9   : > { %1138 = vmatmul.msk.f32.gmra.mxu0 %vm297_vm0, %v241_v16  ;;  %815 = vmatpush.msrb.mxu3 %v633_v12  ;;  %v691_v12 = vld [vmem:[%s1905_s2 + $0x80] sm:$0xff]  ;;  %v689_v16 = vld [vmem:[%s1905_s2 + $0x70] sm:$0xff] }
  0xcb   : > { %816 = vmatpush.msrb.mxu3 %v630_v8  ;;  %v677_v8 = vld [vmem:[%s1905_s2 + $0x10] sm:$0xff] }
  0xcc   : > { %v1610_v19 = vpop.f32.mrf.mxu2 }
  0xce   : > { %v1612_v20 = vpop.f32.mrf.mxu0  ;;  %v1621_v26 = vpop.f32.mrf.mxu3 }
  0xd0   : > { %v579_v31 = vpop.f32.mrf.mxu1 }
  0xd1   : > { %1139 = vmatmul.msk.f32.gmra.mxu0 %vm297_vm0, %v242_v21  ;;  %v680_v21 = vld [vmem:[%s1905_s2 + $0x28] sm:$0xff] }
  0xd4   : > { %v1616_v23 = vpop.f32.mrf.mxu2 }
  0xd6   : > { %v1618_v24 = vpop.f32.mrf.mxu0  ;;  %v1625_v32 = vpop.f32.mrf.mxu3 }
  0xd8   : > { %v582_v36 = vpop.f32.mrf.mxu1 }
  0xd9   : > { %1140 = vmatmul.msk.f32.gmra.mxu0 %vm297_vm0, %v243_v25  ;;  %775 = vmatpush.msrb.mxu2 %v582_v36  ;;  %v701_v25 = vld [vmem:[%s1905_s2 + $0xd0] sm:$0xff]  ;;  %v698_v36 = vld [vmem:[%s1905_s2 + $0xb8] sm:$0xff] }
  0xdb   : > { %776 = vmatpush.msrb.mxu2 %v579_v31  ;;  %v696_v31 = vld [vmem:[%s1905_s2 + $0xa8] sm:$0xff] }
  0xdc   : > { %v600_v28 = vpop.f32.mrf.mxu2 }
  0xdd   : > { %777 = vmatpush.msrb.mxu2 %v576_v27  ;;  %v682_v27 = vld [vmem:[%s1905_s2 + $0x38] sm:$0xff] }
  0xde   : > { %v513_v29 = vpop.f32.mrf.mxu0  ;;  %v1630_v37 = vpop.f32.mrf.mxu3 }
  0xdf   : > { %778 = vmatpush.msrb.mxu2 %v573_v22  ;;  %v697_v22 = vld [vmem:[%s1905_s2 + $0xb0] sm:$0xff] }
  0xe1   : > { %1141 = vmatmul.msk.f32.gmra.mxu0 %vm297_vm0, %v244_v30  ;;  %779 = vmatpush.msrb.mxu2 %v570_v18  ;;  %v676_v18 = vld [vmem:[%s1905_s2 + $0x8] sm:$0xff]  ;;  %v686_v30 = vld [vmem:[%s1905_s2 + $0x58] sm:$0xff] }
  0xe3   : > { %780 = vmatpush.msrb.mxu2 %v567_v13 }
  0xe4   : > { %v603_v33 = vpop.f32.mrf.mxu2 }
  0xe6   : > { %v516_v34 = vpop.f32.mrf.mxu0  ;;  %v1632_v41 = vpop.f32.mrf.mxu3 }
  0xe9   : > { %1142 = vmatmul.msk.f32.gmra.mxu0 %vm297_vm0, %v245_v35  ;;  %v704_v35 = vld [vmem:[%s1905_s2 + $0xe8] sm:$0xf] }
  0xec   : > { %v606_v38 = vpop.f32.mrf.mxu2 }
  0xee   : > { %v519_v39 = vpop.f32.mrf.mxu0  ;;  %v1634_v45 = vpop.f32.mrf.mxu3 }
  0xf4   : > { %v609_v40 = vpop.f32.mrf.mxu2 }
  0xf6   : > { %v522_v42 = vpop.f32.mrf.mxu0  ;;  %v654_v48 = vpop.f32.mrf.mxu3 }
  0xfc   : > { %v612_v43 = vpop.f32.mrf.mxu2 }
  0xfe   : > { %v525_v44 = vpop.f32.mrf.mxu0  ;;  %v657_v51 = vpop.f32.mrf.mxu3 }
 0x104   : > { %v615_v46 = vpop.f32.mrf.mxu2 }
 0x106   : > { %v528_v47 = vpop.f32.mrf.mxu0  ;;  %v660_v55 = vpop.f32.mrf.mxu3 }
 0x10c   : > { %v618_v49 = vpop.f32.mrf.mxu2 }
 0x10e   : > { %v531_v50 = vpop.f32.mrf.mxu0  ;;  %v663_v59 = vpop.f32.mrf.mxu3 }
 0x114   : > { %v621_v52 = vpop.f32.mrf.mxu2 }
 0x116   : > { %v534_v53 = vpop.f32.mrf.mxu0  ;;  %v666_v61 = vpop.f32.mrf.mxu3 }
 0x11c   : > { %v624_v54 = vpop.f32.mrf.mxu2 }
 0x11e   : > { %v537_v56 = vpop.f32.mrf.mxu0  ;;  %v669_v63 = vpop.f32.mrf.mxu3 }
 0x124   : > { %v627_v57 = vpop.f32.mrf.mxu2 }
 0x125   : > { %817 = vmatpush.msrb.mxu3 %v627_v57  ;;  %v899_v57 = vld [vmem:[%s1906_s3] sm:$0xff] }
 0x126   : > { %v540_v58 = vpop.f32.mrf.mxu0  ;;  %v672_v2 = vpop.f32.mrf.mxu3 }
 0x127   : > { %732 = vmatpush.msrb.mxu1 %v540_v58  ;;  %818 = vmatpush.msrb.mxu3 %v624_v54  ;;  %v1187_v58 = vld [vmem:[%s1906_s3 + $0x40] sm:$0xff] }
 0x129   : > { %733 = vmatpush.msrb.mxu1 %v537_v56  ;;  %819 = vmatpush.msrb.mxu3 %v621_v52 }
 0x12b   : > { %734 = vmatpush.msrb.mxu1 %v534_v53  ;;  %820 = vmatpush.msrb.mxu3 %v618_v49 }
 0x12d   : > { %735 = vmatpush.msrb.mxu1 %v531_v50  ;;  %821 = vmatpush.msrb.mxu3 %v615_v46 }
 0x12e   : > { %v1636_v60 = vpop.f32.mrf.mxu0 }
 0x12f   : > { %736 = vmatpush.msrb.mxu1 %v528_v47  ;;  %822 = vmatpush.msrb.mxu3 %v612_v43 }
 0x131   : > { %737 = vmatpush.msrb.mxu1 %v525_v44  ;;  %823 = vmatpush.msrb.mxu3 %v609_v40 }
 0x133   : > { %738 = vmatpush.msrb.mxu1 %v522_v42  ;;  %824 = vmatpush.msrb.mxu3 %v606_v38  ;;  %v706_v38 = vld [vmem:[%s1905_s2 + $0xf8] sm:$0xf] }
 0x135   : > { %739 = vmatpush.msrb.mxu1 %v519_v39  ;;  %825 = vmatpush.msrb.mxu3 %v603_v33  ;;  %v700_v33 = vld [vmem:[%s1905_s2 + $0xc8] sm:$0xff] }
 0x136   : > { %v546_v62 = vpop.f32.mrf.mxu0 }
 0x137   : > { %740 = vmatpush.msrb.mxu1 %v516_v34  ;;  %826 = vmatpush.msrb.mxu3 %v600_v28  ;;  %v705_v28 = vld [vmem:[%s1905_s2 + $0xf0] sm:$0xf]  ;;  %v694_v34 = vld [vmem:[%s1905_s2 + $0x98] sm:$0xff] }
 0x139   : > { %741 = vmatpush.msrb.mxu1 %v513_v29  ;;  %827 = vmatpush.msrb.mxu3 %v1616_v23  ;;  %v684_v23 = vld [vmem:[%s1905_s2 + $0x48] sm:$0xff] }
 0x13a   : > { %v692_v29 = vld [vmem:[%s1905_s2 + $0x88] sm:$0xff] }
 0x13b   : > { %742 = vmatpush.msrb.mxu1 %v1618_v24  ;;  %828 = vmatpush.msrb.mxu3 %v1610_v19  ;;  %v693_v19 = vld [vmem:[%s1905_s2 + $0x90] sm:$0xff]  ;;  %v678_v24 = vld [vmem:[%s1905_s2 + $0x18] sm:$0xff] }
 0x13d   : > { %743 = vmatpush.msrb.mxu1 %v1612_v20  ;;  %829 = vmatpush.msrb.mxu3 %v1604_v14  ;;  %v685_v14 = vld [vmem:[%s1905_s2 + $0x50] sm:$0xff]  ;;  %v703_v20 = vld [vmem:[%s1905_s2 + $0xe0] sm:$0xf] }
 0x13e   : > { %v549_v0 = vpop.f32.mrf.mxu0  ;;  %830 = vmatmul.f32.vlgmr.msrb.gmra.mxu3 %v677_v8 }
 0x13f   : > { %744 = vmatpush.msrb.mxu1 %v1606_v15  ;;  %v695_v15 = vld [vmem:[%s1905_s2 + $0xa0] sm:$0xff] }
 0x141   : > { %745 = vmatpush.msrb.mxu1 %v1600_v10 }
 0x143   : > { %746 = vmatpush.msrb.mxu1 %v1596_v6  ;;  %v683_v6 = vld [vmem:[%s1905_s2 + $0x40] sm:$0xff] }
 0x145   : > { %747 = vmatpush.msrb.mxu1 %v1592_v3 }
 0x146   : > { %v552_v4 = vpop.f32.mrf.mxu0  ;;  %748 = vmatmul.f32.vlgmr.msrb.gmra.mxu1 %v675_v1  ;;  %833 = vmatmul.f32.gmra.mxu3 %v681_v11  ;;  %v900_v1 = vld [vmem:[%s1906_s3 + $0x8] sm:$0xff] }
 0x147   : > { %859 = vmatpush.msra.mxu1 %v672_v2  ;;  %v1188_v2 = vld [vmem:[%s1906_s3 + $0x48] sm:$0xff] }
 0x149   : > { %860 = vmatpush.msra.mxu1 %v669_v63 }
 0x14b   : > { %861 = vmatpush.msra.mxu1 %v666_v61 }
 0x14d   : > { %862 = vmatpush.msra.mxu1 %v663_v59  ;;  %v1195_v59 = vld [vmem:[%s1906_s3 + $0x80] sm:$0xff] }
 0x14e   : > { %v555_v7 = vpop.f32.mrf.mxu0  ;;  %751 = vmatmul.f32.gmra.mxu1 %v679_v5  ;;  %836 = vmatmul.f32.gmra.mxu3 %v685_v14 }
 0x14f   : > { %863 = vmatpush.msra.mxu1 %v660_v55 }
 0x151   : > { %864 = vmatpush.msra.mxu1 %v657_v51 }
 0x153   : > { %865 = vmatpush.msra.mxu1 %v654_v48 }
 0x155   : > { %866 = vmatpush.msra.mxu1 %v1634_v45 }
 0x156   : > { %v558_v3 = vpop.f32.mrf.mxu0  ;;  %754 = vmatmul.f32.gmra.mxu1 %v683_v6  ;;  %839 = vmatmul.f32.gmra.mxu3 %v689_v16 }
 0x157   : > { %867 = vmatpush.msra.mxu1 %v1632_v41 }
 0x159   : > { %868 = vmatpush.msra.mxu1 %v1630_v37  ;;  %v702_v37 = vld [vmem:[%s1905_s2 + $0xd8] sm:$0xff] }
 0x15b   : > { %869 = vmatpush.msra.mxu1 %v1625_v32  ;;  %v690_v32 = vld [vmem:[%s1905_s2 + $0x78] sm:$0xff] }
 0x15d   : > { %870 = vmatpush.msra.mxu1 %v1621_v26  ;;  %v688_v26 = vld [vmem:[%s1905_s2 + $0x68] sm:$0xff] }
 0x15e   : > { %v561_v10 = vpop.f32.mrf.mxu0  ;;  %757 = vmatmul.f32.gmra.mxu1 %v687_v9  ;;  %842 = vmatmul.f32.gmra.mxu3 %v693_v19 }
 0x166   : > { %v564_v13 = vpop.f32.mrf.mxu0  ;;  %760 = vmatmul.f32.gmra.mxu1 %v691_v12  ;;  %845 = vmatmul.f32.gmra.mxu3 %v697_v22 }
 0x167   : > { %781 = vmatpush.msrb.mxu2 %v564_v13 }
 0x169   : > { %782 = vmatpush.msrb.mxu2 %v561_v10 }
 0x16b   : > { %783 = vmatpush.msrb.mxu2 %v558_v3 }
 0x16d   : > { %784 = vmatpush.msrb.mxu2 %v555_v7 }
 0x16e   : > { %763 = vmatmul.f32.gmra.mxu1 %v695_v15  ;;  %848 = vmatmul.f32.gmra.mxu3 %v701_v25  ;;  %v1197_v25 = vld [vmem:[%s1906_s3 + $0x90] sm:$0xff] }
 0x16f   : > { %785 = vmatpush.msrb.mxu2 %v552_v4  ;;  %v1196_v4 = vld [vmem:[%s1906_s3 + $0x88] sm:$0xff] }
 0x171   : > { %786 = vmatpush.msrb.mxu2 %v549_v0 }
 0x173   : > { %787 = vmatpush.msrb.mxu2 %v546_v62 }
 0x175   : > { %788 = vmatpush.msrb.mxu2 %v1636_v60 }
 0x176   : > { %766 = vmatmul.f32.gmra.mxu1 %v699_v17  ;;  %789 = vmatmul.f32.vlgmr.msrb.gmra.mxu2 %v676_v18 }
 0x177   : > { %851 = vmatmul.f32.gmra.mxu3 %v705_v28 }
 0x17e   : > { %769 = vmatmul.f32.gmra.mxu1 %v703_v20  ;;  %792 = vmatmul.f32.gmra.mxu2 %v680_v21 }
 0x186   : > { %795 = vmatmul.f32.gmra.mxu2 %v684_v23  ;;  %1179 = vmatmul.msk.f32.vlgmr.msra.gmra.mxu1 %vm707_vm1, %v678_v24  ;;  %v901_v23 = vld [vmem:[%s1906_s3 + $0x10] sm:$0xff] }
 0x187   : > { %v1189_v24 = vld [vmem:[%s1906_s3 + $0x50] sm:$0xff] }
 0x18e   : > { %798 = vmatmul.f32.gmra.mxu2 %v688_v26  ;;  %1180 = vmatmul.msk.f32.gmra.mxu1 %vm707_vm1, %v682_v27 }
 0x196   : > { %801 = vmatmul.f32.gmra.mxu2 %v692_v29  ;;  %1181 = vmatmul.msk.f32.gmra.mxu1 %vm707_vm1, %v686_v30 }
 0x19e   : > { %804 = vmatmul.f32.gmra.mxu2 %v696_v31  ;;  %1182 = vmatmul.msk.f32.gmra.mxu1 %vm707_vm1, %v690_v32 }
 0x1a6   : > { %807 = vmatmul.f32.gmra.mxu2 %v700_v33  ;;  %1183 = vmatmul.msk.f32.gmra.mxu1 %vm707_vm1, %v694_v34 }
 0x1ae   : > { %810 = vmatmul.f32.gmra.mxu2 %v704_v35  ;;  %1184 = vmatmul.msk.f32.gmra.mxu1 %vm707_vm1, %v698_v36 }
 0x1b6   : > { %1185 = vmatmul.msk.f32.gmra.mxu1 %vm707_vm1, %v702_v37 }
 0x1be   : > { %1186 = vmatmul.msk.f32.gmra.mxu1 %vm707_vm1, %v706_v38 }
 0x1c1   : > { %v831_v45 = vpop.f32.mrf.mxu3 }
 0x1c3   : > { %v749_v39 = vpop.f32.mrf.mxu1 }
 0x1c9   : > { %v834_v49 = vpop.f32.mrf.mxu3 }
 0x1cb   : > { %v752_v40 = vpop.f32.mrf.mxu1 }
 0x1d1   : > { %v837_v54 = vpop.f32.mrf.mxu3 }
 0x1d3   : > { %v755_v41 = vpop.f32.mrf.mxu1 }
 0x1d9   : > { %v840_v12 = vpop.f32.mrf.mxu3 }
 0x1db   : > { %v758_v42 = vpop.f32.mrf.mxu1 }
 0x1e1   : > { %v843_v38 = vpop.f32.mrf.mxu3 }
 0x1e3   : > { %v1757_v43 = vpop.f32.mrf.mxu1 }
 0x1eb   : > { %v1759_v44 = vpop.f32.mrf.mxu1 }
 0x1f3   : > { %v1761_v46 = vpop.f32.mrf.mxu1 }
 0x1f9   : > { %v790_v47 = vpop.f32.mrf.mxu2 }
 0x1fa   : > { %v791_v50 = vadd.f32 %v790_v47, %v749_v39 }
 0x1fb   : > { %v1763_v48 = vpop.f32.mrf.mxu1 }
 0x1fc   : > { %v832_v53 = vadd.f32 %v831_v45, %v791_v50  ;;  %v1198_v45 = vld [vmem:[%s1906_s3 + $0x98] sm:$0xff] }
 0x201   : > { %v793_v51 = vpop.f32.mrf.mxu2 }
 0x202   : > { %v794_v55 = vadd.f32 %v793_v51, %v752_v40 }
 0x203   : > { %v872_v52 = vpop.f32.mrf.mxu1 }
 0x204   : > { %v873_v56 = vadd.f32 %v872_v52, %v832_v53  ;;  %v835_v61 = vadd.f32 %v834_v49, %v794_v55 }
 0x206   : > { %v907_v62 = vmul.f32 %v899_v57, %v873_v56  ;;  %v953_v63 = vmul.f32 %v1187_v58, %v873_v56  ;;  %v997_v5 = vmul.f32 %v1195_v59, %v873_v56 }
 0x208   : > { %v916_v10 = vsel %vm915_vm2, %v907_v62, 0.0  ;;  %v961_v11 = vsel %vm915_vm2, %v953_v63, 0.0  ;;  %v1005_v13 = vsel %vm915_vm2, %v997_v5, 0.0  ;;  %v1191_v63 = vld [vmem:[%s1906_s3 + $0x60] sm:$0xff] }
 0x209   : > { %v796_v60 = vpop.f32.mrf.mxu2 }
 0x20a   : > { %v797_v6 = vadd.f32 %v796_v60, %v755_v41  ;;  %v902_v41 = vld [vmem:[%s1906_s3 + $0x18] sm:$0xff] }
 0x20b   : > { %v875_v0 = vpop.f32.mrf.mxu1 }
 0x20c   : > { %v876_v7 = vadd.f32 %v875_v0, %v835_v61  ;;  %v838_v21 = vadd.f32 %v837_v54, %v797_v6  ;;  %v846_v61 = vpop.f32.mrf.mxu3  ;;  %v1199_v0 = vld [vmem:[%s1906_s3 + $0xa0] sm:$0xff] }
 0x20e   : > { %v908_v3 = vmul.f32 %v900_v1, %v876_v7  ;;  %v954_v8 = vmul.f32 %v1188_v2, %v876_v7  ;;  %v998_v9 = vmul.f32 %v1196_v4, %v876_v7 }
 0x210   : > { %v917_v14 = vsel %vm915_vm2, %v908_v3, 0.0  ;;  %v962_v15 = vsel %vm915_vm2, %v954_v8, 0.0  ;;  %v1006_v16 = vsel %vm915_vm2, %v998_v9, 0.0 }
 0x211   : > { %v918_v17 = vadd.f32 %v917_v14, %v916_v10  ;;  %v963_v18 = vadd.f32 %v962_v15, %v961_v11  ;;  %v1007_v19 = vadd.f32 %v1006_v16, %v1005_v13  ;;  %v799_v20 = vpop.f32.mrf.mxu2  ;;  %v904_v15 = vld [vmem:[%s1906_s3 + $0x28] sm:$0xff] }
 0x212   : > { %v800_v27 = vadd.f32 %v799_v20, %v758_v42  ;;  %v1190_v42 = vld [vmem:[%s1906_s3 + $0x58] sm:$0xff]  ;;  %v1200_v16 = vld [vmem:[%s1906_s3 + $0xa8] sm:$0xff] }
 0x213   : > { %v878_v22 = vpop.f32.mrf.mxu1 }
 0x214   : > { %v879_v26 = vadd.f32 %v878_v22, %v838_v21  ;;  %v841_v39 = vadd.f32 %v840_v12, %v800_v27 }
 0x216   : > { %v909_v28 = vmul.f32 %v901_v23, %v879_v26  ;;  %v955_v29 = vmul.f32 %v1189_v24, %v879_v26  ;;  %v999_v30 = vmul.f32 %v1197_v25, %v879_v26 }
 0x218   : > { %v919_v31 = vsel %vm915_vm2, %v909_v28, 0.0  ;;  %v964_v32 = vsel %vm915_vm2, %v955_v29, 0.0  ;;  %v1008_v33 = vsel %vm915_vm2, %v999_v30, 0.0 }
 0x219   : > { %v920_v34 = vadd.f32 %v919_v31, %v918_v17  ;;  %v965_v35 = vadd.f32 %v964_v32, %v963_v18  ;;  %v1009_v36 = vadd.f32 %v1008_v33, %v1007_v19  ;;  %v802_v37 = vpop.f32.mrf.mxu2  ;;  %v849_v18 = vpop.f32.mrf.mxu3  ;;  %v905_v32 = vld [vmem:[%s1906_s3 + $0x30] sm:$0xff] }
 0x21a   : > { %v803_v49 = vadd.f32 %v802_v37, %v1757_v43  ;;  %v903_v43 = vld [vmem:[%s1906_s3 + $0x20] sm:$0xff]  ;;  %v1201_v33 = vld [vmem:[%s1906_s3 + $0xb0] sm:$0xff] }
 0x21b   : > { %v881_v40 = vpop.f32.mrf.mxu1 }
 0x21c   : > { %v882_v47 = vadd.f32 %v881_v40, %v841_v39  ;;  %v844_v60 = vadd.f32 %v843_v38, %v803_v49 }
 0x21e   : > { %v910_v50 = vmul.f32 %v902_v41, %v882_v47  ;;  %v956_v51 = vmul.f32 %v1190_v42, %v882_v47  ;;  %v1000_v52 = vmul.f32 %v1198_v45, %v882_v47 }
 0x220   : > { %v921_v53 = vsel %vm915_vm2, %v910_v50, 0.0  ;;  %v966_v54 = vsel %vm915_vm2, %v956_v51, 0.0  ;;  %v1010_v55 = vsel %vm915_vm2, %v1000_v52, 0.0  ;;  %v906_v52 = vld [vmem:[%s1906_s3 + $0x38] sm:$0xf] }
 0x221   : > { %v922_v56 = vadd.f32 %v921_v53, %v920_v34  ;;  %v967_v57 = vadd.f32 %v966_v54, %v965_v35  ;;  %v1011_v58 = vadd.f32 %v1010_v55, %v1009_v36  ;;  %v805_v59 = vpop.f32.mrf.mxu2  ;;  %v852_v39 = vpop.f32.mrf.mxu3  ;;  %v1202_v53 = vld [vmem:[%s1906_s3 + $0xb8] sm:$0xf] }
 0x222   : > { %v806_v2 = vadd.f32 %v805_v59, %v1759_v44  ;;  %v1192_v44 = vld [vmem:[%s1906_s3 + $0x68] sm:$0xff] }
 0x223   : > { %v884_v62 = vpop.f32.mrf.mxu1 }
 0x224   : > { %v885_v1 = vadd.f32 %v884_v62, %v844_v60  ;;  %v847_v13 = vadd.f32 %v846_v61, %v806_v2 }
 0x226   : > { %v911_v4 = vmul.f32 %v903_v43, %v885_v1  ;;  %v957_v5 = vmul.f32 %v1191_v63, %v885_v1  ;;  %v1001_v7 = vmul.f32 %v1199_v0, %v885_v1 }
 0x228   : > { %v923_v6 = vsel %vm915_vm2, %v911_v4, 0.0  ;;  %v968_v3 = vsel %vm915_vm2, %v957_v5, 0.0  ;;  %v1012_v8 = vsel %vm915_vm2, %v1001_v7, 0.0 }
 0x229   : > { %v924_v9 = vadd.f32 %v923_v6, %v922_v56  ;;  %v969_v10 = vadd.f32 %v968_v3, %v967_v57  ;;  %v1013_v11 = vadd.f32 %v1012_v8, %v1011_v58  ;;  %v808_v12 = vpop.f32.mrf.mxu2 }
 0x22a   : > { %v809_v19 = vadd.f32 %v808_v12, %v1761_v46  ;;  %v1193_v46 = vld [vmem:[%s1906_s3 + $0x70] sm:$0xff] }
 0x22b   : > { %v887_v14 = vpop.f32.mrf.mxu1 }
 0x22c   : > { %v888_v17 = vadd.f32 %v887_v14, %v847_v13  ;;  %v850_v29 = vadd.f32 %v849_v18, %v809_v19  ;;  %v896_v19 = vlaneseq }
 0x22e   : > { %v912_v20 = vmul.f32 %v904_v15, %v888_v17  ;;  %v958_v21 = vmul.f32 %v1192_v44, %v888_v17  ;;  %v1002_v22 = vmul.f32 %v1200_v16, %v888_v17 }
 0x230   : > { %v925_v23 = vsel %vm915_vm2, %v912_v20, 0.0  ;;  %v970_v24 = vsel %vm915_vm2, %v958_v21, 0.0  ;;  %v1014_v25 = vsel %vm915_vm2, %v1002_v22, 0.0  ;;  %v897_v20 = vand.u32 127, %v896_v19  ;;  %v898_v22 = vld [vmem:[%s1907_s4] sm:$0x1] }
 0x231   : > { %v926_v26 = vadd.f32 %v925_v23, %v924_v9  ;;  %v971_v27 = vadd.f32 %v970_v24, %v969_v10  ;;  %v1015_v28 = vadd.f32 %v1014_v25, %v1013_v11  ;;  %v811_v30 = vpop.f32.mrf.mxu2 }
 0x232   : > { %v812_v35 = vadd.f32 %v811_v30, %v1763_v48  ;;  %v1194_v48 = vld [vmem:[%s1906_s3 + $0x78] sm:$0xf]  ;;  %vm941_vm4 = vcmp.eq.s32.totalorder %v897_v20, 0  ;;  %vm985_vm5 = vcmp.eq.s32.totalorder %v897_v20, 1  ;;  %vm1029_vm6 = vcmp.eq.s32.totalorder %v897_v20, 2 }
 0x233   : > { %v890_v31 = vpop.f32.mrf.mxu1 }
 0x234   : > { %v891_v34 = vadd.f32 %v890_v31, %v850_v29  ;;  %v853_v50 = vadd.f32 %v852_v39, %v812_v35 }
 0x236   : > { %v913_v36 = vmul.f32 %v905_v32, %v891_v34  ;;  %v959_v37 = vmul.f32 %v1193_v46, %v891_v34  ;;  %v1003_v38 = vmul.f32 %v1201_v33, %v891_v34 }
 0x238   : > { %v927_v40 = vsel %vm915_vm2, %v913_v36, 0.0  ;;  %v972_v41 = vsel %vm915_vm2, %v959_v37, 0.0  ;;  %v1016_v42 = vsel %vm915_vm2, %v1003_v38, 0.0 }
 0x239   : > { %v928_v45 = vadd.f32 %v927_v40, %v926_v26  ;;  %v973_v47 = vadd.f32 %v972_v41, %v971_v27  ;;  %v1017_v49 = vadd.f32 %v1016_v42, %v1015_v28 }
 0x23b   : > { %v893_v51 = vpop.f32.mrf.mxu1 }
 0x23c   : > { %v894_v54 = vadd.f32 %v893_v51, %v853_v50 }
 0x23e   : > { %v914_v55 = vmul.f32 %v906_v52, %v894_v54  ;;  %v960_v56 = vmul.f32 %v1194_v48, %v894_v54  ;;  %v1004_v57 = vmul.f32 %v1202_v53, %v894_v54 }
 0x240   : > { %v930_v58 = vsel %vm929_vm3, %v914_v55, 0.0  ;;  %v974_v59 = vsel %vm929_vm3, %v960_v56, 0.0  ;;  %v1018_v60 = vsel %vm929_vm3, %v1004_v57, 0.0 }
 0x241   : > { %v975_v61 = vadd.f32 %v974_v59, %v973_v47  ;;  %v1019_v62 = vadd.f32 %v1018_v60, %v1017_v49  ;;  %v931_v43 = vadd.f32 %v930_v58, %v928_v45 }
 0x243   : > { %v1020_v63 = vrot.slane %v1019_v62, 4  ;;  %v932_v0 = vrot.slane %v931_v43, 4  ;;  %v976_v1 = vrot.slane %v975_v61, 4 }
 0x245   : > { %v1021_v2 = vadd.f32 %v1020_v63, %v1019_v62  ;;  %v933_v4 = vadd.f32 %v932_v0, %v931_v43  ;;  %v977_v5 = vadd.f32 %v976_v1, %v975_v61 }
 0x247   : > { %v1022_v7 = vrot.slane %v1021_v2, 2  ;;  %v934_v6 = vrot.slane %v933_v4, 2  ;;  %v978_v3 = vrot.slane %v977_v5, 2 }
 0x249   : > { %v1023_v8 = vadd.f32 %v1022_v7, %v1021_v2  ;;  %v935_v9 = vadd.f32 %v934_v6, %v933_v4  ;;  %v979_v12 = vadd.f32 %v978_v3, %v977_v5 }
 0x24b   : > { %v1024_v10 = vrot.slane %v1023_v8, 1  ;;  %v936_v11 = vrot.slane %v935_v9, 1  ;;  %v980_v16 = vrot.slane %v979_v12, 1 }
 0x24d   : > { %v1025_v13 = vadd.f32 %v1024_v10, %v1023_v8  ;;  %v937_v14 = vadd.f32 %v936_v11, %v935_v9  ;;  %v981_v17 = vadd.f32 %v980_v16, %v979_v12 }
 0x24f   : > { %v1026_v15 = vsel %vm915_vm2, %v1025_v13, 0.0  ;;  %v938_v44 = vsel %vm915_vm2, %v937_v14, 0.0  ;;  %v982_v18 = vsel %vm915_vm2, %v981_v17, 0.0 }
 0x250   : > { %1027 = vadd.xlane.f32.xlu1 %v1026_v15  ;;  %939 = vadd.xlane.f32.xlu0 %v938_v44 }
 0x258   : > { %983 = vadd.xlane.f32.xlu0 %v982_v18 }
 0x2c3   : > { %v940_v21 = vpop.xlane.xlu0 %939  ;;  %v1028_v24 = vpop.xlane.xlu1 %1027 }
 0x2c4   : > { %v942_v23 = vsel %vm941_vm4, %v940_v21, 0.0  ;;  %v1030_v29 = vsel %vm1029_vm6, %v1028_v24, 0.0 }
 0x2c5   : > { %v943_v25 = vadd.f32 %v942_v23, %v898_v22 }
 0x2cb   : > { %v984_v26 = vpop.xlane.xlu0 %983 }
 0x2cc   : > { %v986_v27 = vsel %vm985_vm5, %v984_v26, 0.0 }
 0x2cd   : > { %v987_v28 = vadd.f32 %v986_v27, %v943_v25 }
 0x2cf   : > { %v1031_v30 = vadd.f32 %v1030_v29, %v987_v28 }
 0x2d1   : > { %v1033_v31 = vsel %vm1032_vm7, %v1031_v30, -inf }
 0x2d2   : > { %1034 = vmax.xlane.f32.xlu1 %v1033_v31 }
 0x345   : > { %v1035_v32 = vpop.xlane.xlu1 %1034 }
 0x346   : > { %v1036_v46 = vsub.f32 %v1031_v30, %v1035_v32 }
 0x348   : > { %v1037_v33 = vmul.f32 1.442695, %v1036_v46 }
 0x34a   : > { %1290 = vpow2.f32 %v1037_v33 }
 0x350   : > { %v1291_v34 = vpop.eup %1290 }
 0x351   : > { %v1039_v35 = vsel %vm1032_vm7, %v1291_v34, 0.0 }
 0x352   : > { %1040 = vadd.xlane.f32.xlu2 %v1039_v35 }
 0x3c5   : > { %v1041_v36 = vpop.xlane.xlu2 %1040 }
 0x3c6   : > { %1292 = vlog2.f32 %v1041_v36 }
 0x3cc   : > { %v1293_v37 = vpop.eup %1292 }
 0x3cd   : > { %v1043_v38 = vmul.f32 0.6931472, %v1293_v37 }
 0x3cf   : > { %v1044_v39 = vsub.f32 %v1036_v46, %v1043_v38 }
 0x3d1   : > { %1045 = vst.msk [vmem:[%s216_s14] sm:$0x1] %vm1032_vm7, %v1044_v39 }
 0x3d2   : > { %1321 = shalt.err (!%p1318_p3)
}
 0x3d3   : > { %1251 = dma.vmem_to_hbm [thread:$0]  (%p1426_p5), %s1058_s15, 16, %s1060_s16, %s1047_s17  }
 0x3d4 PF: > { %p1257_p4 = scmp.ge.s32.totalorder %s1356_s21, 2  ;;  %s1071_s8 = sand.u32 1, %s1344_s18  }
 0x3d5   : > { %s1072_s9 = scalar_lea.sflag [#allocation3], %s1071_s8 }
 0x3d6   : > { %p1254_p7 = pnand %p1257_p4, %p1430_p6 }
 0x3d8   : > { %p1255_p8 = pneg %p1254_p7 }
 0x3da   : > { %1339 = dma.done.wait (%p1255_p8), %s1072_s9, 16  }
 0x3db   : > { %1341 = vsyncadd (%p1255_p8), %s1072_s9, 4294967280  ;;  %p15_p9 = scmp.ge.s32.totalorder %s1413_s24, 4   ;;  %s1911_s18 = smov %s1348_s19 }
 0x3dc   : > { %s1912_s19 = smov %s1352_s20  ;;  %s1913_s20 = smov %s1424_s27 }
 0x3dd   : > { %s1914_s21 = smov %s1413_s24  ;;  %17 = sbr.rel (!%p15_p9) target bundleno = 3 (0x3), region = 77 }
 0x3e2   :  { %1077 = vsyncpa [#allocation3], 1 }
 0x3e3   :  { %1079 = vsyncpa [#allocation3 + $0x1], 1 }

</bundles_post_ra>
